<compile_context>
chip_gen: v7x
topology: tpu7x:2x2x1
jax: 0.10.0
libtpu: 0.0.40
codegen_flags: <defaults>
</compile_context>

<pallas_src>
import jax
import jax.numpy as jnp
import numpy as np
from jax.experimental import pallas as pl
from jax.experimental.pallas import tpu as pltpu


def _make_wce_kernel(C, ts, acc_rows, n_rows, ragged):
    """Builds the kernel with all shape parameters baked in statically."""

    def kernel(x_ref, t_ref, w_ref, num_ref, den_ref):
        # x_ref: (C, ts, 128) logits (native dtype), t_ref: (ts, 128) int32 targets,
        # w_ref: (C,) f32 class weights in SMEM,
        # num_ref/den_ref: (acc_rows, 128) f32 output slabs, resident across the
        # pixel-tile axis (accumulator pattern).
        i = pl.program_id(1)

        @pl.when(i == 0)
        def _init():
            num_ref[...] = jnp.zeros_like(num_ref)
            den_ref[...] = jnp.zeros_like(den_ref)

        t = t_ref[...]

        # --- class reductions as elementwise VPU ops over the leading C dim ---
        m = x_ref[0].astype(jnp.float32)
        for c in range(1, C):
            m = jnp.maximum(m, x_ref[c].astype(jnp.float32))

        se = jnp.zeros_like(m)        # sum_c exp(x_c - m)
        picked = jnp.zeros_like(m)    # x[y]
        wpix = jnp.zeros_like(m)      # w[y]  (0 for out-of-range / padded targets)
        for c in range(C):
            xc = x_ref[c].astype(jnp.float32)
            se = se + jnp.exp(xc - m)
            sel = t == c
            picked = jnp.where(sel, xc, picked)
            wpix = jnp.where(sel, w_ref[c], wpix)

        nll = m + jnp.log(se) - picked          # per-pixel -log softmax[y]

        num_c = wpix * nll
        den_c = wpix

        if ragged:
            # mask pixel rows past the real row count in the last (overhanging) tile;
            # jnp.where is a select, so garbage (even NaN) in the pad region is dropped.
            row = i * ts + jax.lax.broadcasted_iota(jnp.int32, num_c.shape, 0)
            valid = row < n_rows
            num_c = jnp.where(valid, num_c, 0.0)
            den_c = jnp.where(valid, den_c, 0.0)

        # fold (ts, 128) -> (acc_rows, 128) with pure elementwise vreg adds
        if ts == acc_rows:
            num_p, den_p = num_c, den_c
        else:
            num_p = num_c[0:acc_rows]
            den_p = den_c[0:acc_rows]
            for r in range(1, ts // acc_rows):
                lo = r * acc_rows
                num_p = num_p + num_c[lo:lo + acc_rows]
                den_p = den_p + den_c[lo:lo + acc_rows]

        num_ref[...] += num_p
        den_ref[...] += den_p

    return kernel


def weighted_cross_entropy(inputs, target, weights, *, target_block_bytes=2 * 1024 * 1024):
    """WeightedCrossEntropy.forward(inputs, target).

    inputs:  [B, C, H, W] float logits (NCHW, like PyTorch), any float dtype.
    target:  [B, H, W] int class ids in [0, C).
    weights: [C] float per-class weights.
    Returns a scalar float32 loss.
    """
    B, C, H, W = inputs.shape
    LANES = 128
    P = H * W

    x = inputs
    t = target
    if P % LANES != 0:
        # TODO(synk): this fallback materializes one padded copy of the logits; the
        # common segmentation shapes (H*W % 128 == 0) take the copy-free path above.
        pad = (-P) % LANES
        x = jnp.pad(x.reshape(B, C, P), ((0, 0), (0, 0), (0, pad)))
        t = jnp.pad(t.reshape(B, P), ((0, 0), (0, pad)), constant_values=-1)
        P = P + pad

    n_rows = P // LANES
    x = x.reshape(B, C, n_rows, LANES)                  # free reshape, native dtype
    t = t.reshape(B, n_rows, LANES).astype(jnp.int32)
    w = weights.reshape(C).astype(jnp.float32)

    # Tile sizing: aim for ~target_block_bytes of logits per grid step (>=1-2 MiB
    # amortizes the fixed per-step overhead); cap row count to bound VMEM/unrolling.
    bytes_per_row = C * LANES * x.dtype.itemsize
    desired_rows = min(4096, max(8, int(target_block_bytes) // bytes_per_row))
    if n_rows <= desired_rows:
        ts = n_rows                                     # single tile per image
    else:
        ts = max(8, (desired_rows // 8) * 8)            # multiple of 8 sublanes
    acc_rows = 8 if ts % 8 == 0 else ts
    n_tiles = pl.cdiv(n_rows, ts)
    ragged = (n_tiles * ts) != n_rows

    kernel = _make_wce_kernel(C, ts, acc_rows, n_rows, ragged)

    out_shape = (
        jax.ShapeDtypeStruct((B, acc_rows, LANES), jnp.float32),  # weighted-NLL partials
        jax.ShapeDtypeStruct((B, acc_rows, LANES), jnp.float32),  # weight partials
    )

    cost = pl.CostEstimate(
        flops=int(10 * B * C * P),
        transcendentals=int(B * P * (C + 1)),
        bytes_accessed=int(B * C * P * x.dtype.itemsize + B * P * 4 + C * 4
                           + 2 * B * acc_rows * LANES * 4),
    )

    num_parts, den_parts = pl.pallas_call(
        kernel,
        out_shape=out_shape,
        grid_spec=pltpu.PrefetchScalarGridSpec(
            num_scalar_prefetch=0,
            grid=(B, n_tiles),
            in_specs=[
                # logits: C kept as a leading untiled dim; pixel rows tiled
                pl.BlockSpec((None, C, ts, LANES), lambda b, i: (b, 0, i, 0)),
                # targets: dense (ts, 128) tile
                pl.BlockSpec((None, ts, LANES), lambda b, i: (b, i, 0)),
                # class weights: whole (C,) array in SMEM (scalar reads)
                pl.BlockSpec(memory_space=pltpu.MemorySpace.SMEM),
            ],
            out_specs=[
                pl.BlockSpec((None, acc_rows, LANES), lambda b, i: (b, 0, 0)),
                pl.BlockSpec((None, acc_rows, LANES), lambda b, i: (b, 0, 0)),
            ],
        ),
        compiler_params=pltpu.CompilerParams(
            dimension_semantics=("parallel", "arbitrary"),
        ),
        cost_estimate=cost,
    )(x, t, w)

    # tiny final reduction + divide (matches PyTorch: NaN if the weight sum is 0)
    return jnp.sum(num_parts) / jnp.sum(den_parts)


def get_classes_count():
    # TODO(synk): get_classes_count() is an external dataset statistic in the original
    # code; a fixed deterministic per-class pixel count is used here instead.
    return np.array([123456.0, 654321.0, 23456.0, 345678.0], dtype=np.float32)


def make_class_weights(classes_count):
    """Mirrors WeightedCrossEntropy.__init__ weight construction."""
    w = jnp.log(jnp.asarray(classes_count, dtype=jnp.float32))
    w = w / jnp.sum(w)
    w = 1.0 / w
    w = w / jnp.sum(w)
    return w


def _wce_ref(inputs, target, weights):
    """Pure-JAX reference (mirrors nn.CrossEntropyLoss(weight=weights), reduction='mean')."""
    B, C, H, W = inputs.shape
    x = jnp.transpose(inputs, (0, 2, 3, 1)).reshape(-1, C).astype(jnp.float32)
    t = target.reshape(-1)
    logp = jax.nn.log_softmax(x, axis=-1)
    nll = -jnp.take_along_axis(logp, t[:, None], axis=1)[:, 0]
    wt = weights[t]
    return jnp.sum(wt * nll) / jnp.sum(wt)


if __name__ == "__main__":
    key = jax.random.PRNGKey(0)
    k1, k2, k3, k4 = jax.random.split(key, 4)

    weights = make_class_weights(get_classes_count())

    # Case 1: module-scale shapes (single pixel tile per image).
    B, C, H, W = 2, 4, 16, 16
    inputs = jax.random.normal(k1, (B, C, H, W), dtype=jnp.float32)
    target = jax.random.randint(k2, (B, H, W), 0, C, dtype=jnp.int32)
    loss = weighted_cross_entropy(inputs, target, weights)
    jax.block_until_ready(loss)
    ref = _wce_ref(inputs, target, weights)
    assert jnp.allclose(loss, ref, rtol=1e-5, atol=1e-5), (loss, ref)

    # Case 2: exercises multi-tile streaming, the (8,128) partial-sum fold and the
    # ragged last-tile mask (20 pixel rows, 16-row tiles -> 2 tiles, last one ragged).
    B2, C2, H2, W2 = 2, 4, 40, 64
    inputs2 = jax.random.normal(k3, (B2, C2, H2, W2), dtype=jnp.float32)
    target2 = jax.random.randint(k4, (B2, H2, W2), 0, C2, dtype=jnp.int32)
    loss2 = weighted_cross_entropy(inputs2, target2, weights,
                                   target_block_bytes=16 * C2 * 128 * 4)
    jax.block_until_ready(loss2)
    ref2 = _wce_ref(inputs2, target2, weights)
    assert jnp.allclose(loss2, ref2, rtol=1e-5, atol=1e-5), (loss2, ref2)

    print("KERNEL_OK")
</pallas_src>

<mosaic_0001>
module attributes {stable_mosaic.version = 11 : i64} {
  func.func @kernel(%arg0: i32, %arg1: i32, %arg2: memref<1x4x2x128xf32, #tpu.memory_space<vmem>>, %arg3: memref<1x2x128xi32, #tpu.memory_space<vmem>>, %arg4: memref<4xf32, #tpu.memory_space<smem>>, %arg5: memref<1x2x128xf32, #tpu.memory_space<vmem>>, %arg6: memref<1x2x128xf32, #tpu.memory_space<vmem>>) attributes {dimension_semantics = [#tpu.dimension_semantics<parallel>, #tpu.dimension_semantics<arbitrary>], iteration_bounds = array<i64: 2, 1>, scalar_prefetch = 0 : i64, scratch_operands = 0 : i64, tpu.core_type = #tpu.core_type<tc>, window_params = [{transform_indices = @transform_0, window_bounds = array<i64: 1, 4, 2, 128>}, {transform_indices = @transform_1, window_bounds = array<i64: 1, 2, 128>}, {transform_indices = @transform_2, window_bounds = array<i64: 4>}, {transform_indices = @transform_3, window_bounds = array<i64: 1, 2, 128>}, {transform_indices = @transform_4, window_bounds = array<i64: 1, 2, 128>}]} {
    %c0_i32 = arith.constant 0 : i32
    %0 = arith.cmpi eq, %arg1, %c0_i32 : i32
    %1 = arith.extui %0 : i1 to i32
    %c0_i32_0 = arith.constant 0 : i32
    %2 = arith.cmpi ne, %1, %c0_i32_0 : i32
    scf.if %2 {
      %cst_51 = arith.constant 0.000000e+00 : f32
      %79 = vector.broadcast %cst_51 : f32 to vector<2x128xf32>
      %c0_52 = arith.constant 0 : index
      %c0_53 = arith.constant 0 : index
      %c0_54 = arith.constant 0 : index
      %80 = vector.load %arg5[%c0_52, %c0_53, %c0_54] : memref<1x2x128xf32, #tpu.memory_space<vmem>>, vector<1x2x128xf32>
      %81 = vector.shape_cast %80 : vector<1x2x128xf32> to vector<2x128xf32>
      %82 = vector.shape_cast %79 : vector<2x128xf32> to vector<1x2x128xf32>
      tpu.vector_store %arg5[%c0_52, %c0_53, %c0_54], %82 {strides = array<i32>} : memref<1x2x128xf32, #tpu.memory_space<vmem>>, vector<1x2x128xf32>,
      %cst_55 = arith.constant 0.000000e+00 : f32
      %83 = vector.broadcast %cst_55 : f32 to vector<2x128xf32>
      %c0_56 = arith.constant 0 : index
      %c0_57 = arith.constant 0 : index
      %c0_58 = arith.constant 0 : index
      %84 = vector.load %arg6[%c0_56, %c0_57, %c0_58] : memref<1x2x128xf32, #tpu.memory_space<vmem>>, vector<1x2x128xf32>
      %85 = vector.shape_cast %84 : vector<1x2x128xf32> to vector<2x128xf32>
      %86 = vector.shape_cast %83 : vector<2x128xf32> to vector<1x2x128xf32>
      tpu.vector_store %arg6[%c0_56, %c0_57, %c0_58], %86 {strides = array<i32>} : memref<1x2x128xf32, #tpu.memory_space<vmem>>, vector<1x2x128xf32>,
    } else {
    }
    %c0 = arith.constant 0 : index
    %c0_1 = arith.constant 0 : index
    %c0_2 = arith.constant 0 : index
    %3 = vector.load %arg3[%c0, %c0_1, %c0_2] : memref<1x2x128xi32, #tpu.memory_space<vmem>>, vector<1x2x128xi32>
    %4 = vector.shape_cast %3 : vector<1x2x128xi32> to vector<2x128xi32>
    %c0_3 = arith.constant 0 : index
    %c0_4 = arith.constant 0 : index
    %c0_5 = arith.constant 0 : index
    %c0_6 = arith.constant 0 : index
    %5 = vector.load %arg2[%c0_3, %c0_4, %c0_5, %c0_6] : memref<1x4x2x128xf32, #tpu.memory_space<vmem>>, vector<1x1x2x128xf32>
    %6 = vector.shape_cast %5 : vector<1x1x2x128xf32> to vector<2x128xf32>
    %c0_7 = arith.constant 0 : index
    %c1 = arith.constant 1 : index
    %c0_8 = arith.constant 0 : index
    %c0_9 = arith.constant 0 : index
    %7 = vector.load %arg2[%c0_7, %c1, %c0_8, %c0_9] : memref<1x4x2x128xf32, #tpu.memory_space<vmem>>, vector<1x1x2x128xf32>
    %8 = vector.shape_cast %7 : vector<1x1x2x128xf32> to vector<2x128xf32>
    %9 = arith.maximumf %6, %8 : vector<2x128xf32>
    %c0_10 = arith.constant 0 : index
    %c2 = arith.constant 2 : index
    %c0_11 = arith.constant 0 : index
    %c0_12 = arith.constant 0 : index
    %10 = vector.load %arg2[%c0_10, %c2, %c0_11, %c0_12] : memref<1x4x2x128xf32, #tpu.memory_space<vmem>>, vector<1x1x2x128xf32>
    %11 = vector.shape_cast %10 : vector<1x1x2x128xf32> to vector<2x128xf32>
    %12 = arith.maximumf %9, %11 : vector<2x128xf32>
    %c0_13 = arith.constant 0 : index
    %c3 = arith.constant 3 : index
    %c0_14 = arith.constant 0 : index
    %c0_15 = arith.constant 0 : index
    %13 = vector.load %arg2[%c0_13, %c3, %c0_14, %c0_15] : memref<1x4x2x128xf32, #tpu.memory_space<vmem>>, vector<1x1x2x128xf32>
    %14 = vector.shape_cast %13 : vector<1x1x2x128xf32> to vector<2x128xf32>
    %15 = arith.maximumf %12, %14 : vector<2x128xf32>
    %cst = arith.constant 0.000000e+00 : f32
    %16 = vector.broadcast %cst : f32 to vector<2x128xf32>
    %cst_16 = arith.constant 0.000000e+00 : f32
    %17 = vector.broadcast %cst_16 : f32 to vector<2x128xf32>
    %cst_17 = arith.constant 0.000000e+00 : f32
    %18 = vector.broadcast %cst_17 : f32 to vector<2x128xf32>
    %c0_18 = arith.constant 0 : index
    %c0_19 = arith.constant 0 : index
    %c0_20 = arith.constant 0 : index
    %c0_21 = arith.constant 0 : index
    %19 = vector.load %arg2[%c0_18, %c0_19, %c0_20, %c0_21] : memref<1x4x2x128xf32, #tpu.memory_space<vmem>>, vector<1x1x2x128xf32>
    %20 = vector.shape_cast %19 : vector<1x1x2x128xf32> to vector<2x128xf32>
    %21 = arith.subf %20, %15 : vector<2x128xf32>
    %22 = math.exp %21 : vector<2x128xf32>
    %23 = arith.addf %16, %22 : vector<2x128xf32>
    %c0_i32_22 = arith.constant 0 : i32
    %24 = vector.broadcast %c0_i32_22 : i32 to vector<2x128xi32>
    %25 = arith.cmpi eq, %4, %24 : vector<2x128xi32>
    %26 = arith.select %25, %20, %17 : vector<2x128xi1>, vector<2x128xf32>
    %c0_23 = arith.constant 0 : index
    %27 = memref.load %arg4[%c0_23] : memref<4xf32, #tpu.memory_space<smem>>
    %28 = vector.broadcast %27 : f32 to vector<2x128xf32>
    %29 = arith.select %25, %28, %18 : vector<2x128xi1>, vector<2x128xf32>
    %c0_24 = arith.constant 0 : index
    %c1_25 = arith.constant 1 : index
    %c0_26 = arith.constant 0 : index
    %c0_27 = arith.constant 0 : index
    %30 = vector.load %arg2[%c0_24, %c1_25, %c0_26, %c0_27] : memref<1x4x2x128xf32, #tpu.memory_space<vmem>>, vector<1x1x2x128xf32>
    %31 = vector.shape_cast %30 : vector<1x1x2x128xf32> to vector<2x128xf32>
    %32 = arith.subf %31, %15 : vector<2x128xf32>
    %33 = math.exp %32 : vector<2x128xf32>
    %34 = arith.addf %23, %33 : vector<2x128xf32>
    %c1_i32 = arith.constant 1 : i32
    %35 = vector.broadcast %c1_i32 : i32 to vector<2x128xi32>
    %36 = arith.cmpi eq, %4, %35 : vector<2x128xi32>
    %37 = arith.select %36, %31, %26 : vector<2x128xi1>, vector<2x128xf32>
    %c1_28 = arith.constant 1 : index
    %38 = memref.load %arg4[%c1_28] : memref<4xf32, #tpu.memory_space<smem>>
    %39 = vector.broadcast %38 : f32 to vector<2x128xf32>
    %40 = arith.select %36, %39, %29 : vector<2x128xi1>, vector<2x128xf32>
    %c0_29 = arith.constant 0 : index
    %c2_30 = arith.constant 2 : index
    %c0_31 = arith.constant 0 : index
    %c0_32 = arith.constant 0 : index
    %41 = vector.load %arg2[%c0_29, %c2_30, %c0_31, %c0_32] : memref<1x4x2x128xf32, #tpu.memory_space<vmem>>, vector<1x1x2x128xf32>
    %42 = vector.shape_cast %41 : vector<1x1x2x128xf32> to vector<2x128xf32>
    %43 = arith.subf %42, %15 : vector<2x128xf32>
    %44 = math.exp %43 : vector<2x128xf32>
    %45 = arith.addf %34, %44 : vector<2x128xf32>
    %c2_i32 = arith.constant 2 : i32
    %46 = vector.broadcast %c2_i32 : i32 to vector<2x128xi32>
    %47 = arith.cmpi eq, %4, %46 : vector<2x128xi32>
    %48 = arith.select %47, %42, %37 : vector<2x128xi1>, vector<2x128xf32>
    %c2_33 = arith.constant 2 : index
    %49 = memref.load %arg4[%c2_33] : memref<4xf32, #tpu.memory_space<smem>>
    %50 = vector.broadcast %49 : f32 to vector<2x128xf32>
    %51 = arith.select %47, %50, %40 : vector<2x128xi1>, vector<2x128xf32>
    %c0_34 = arith.constant 0 : index
    %c3_35 = arith.constant 3 : index
    %c0_36 = arith.constant 0 : index
    %c0_37 = arith.constant 0 : index
    %52 = vector.load %arg2[%c0_34, %c3_35, %c0_36, %c0_37] : memref<1x4x2x128xf32, #tpu.memory_space<vmem>>, vector<1x1x2x128xf32>
    %53 = vector.shape_cast %52 : vector<1x1x2x128xf32> to vector<2x128xf32>
    %54 = arith.subf %53, %15 : vector<2x128xf32>
    %55 = math.exp %54 : vector<2x128xf32>
    %56 = arith.addf %45, %55 : vector<2x128xf32>
    %c3_i32 = arith.constant 3 : i32
    %57 = vector.broadcast %c3_i32 : i32 to vector<2x128xi32>
    %58 = arith.cmpi eq, %4, %57 : vector<2x128xi32>
    %59 = arith.select %58, %53, %48 : vector<2x128xi1>, vector<2x128xf32>
    %c3_38 = arith.constant 3 : index
    %60 = memref.load %arg4[%c3_38] : memref<4xf32, #tpu.memory_space<smem>>
    %61 = vector.broadcast %60 : f32 to vector<2x128xf32>
    %62 = arith.select %58, %61, %51 : vector<2x128xi1>, vector<2x128xf32>
    %63 = math.log %56 : vector<2x128xf32>
    %64 = arith.addf %15, %63 : vector<2x128xf32>
    %65 = arith.subf %64, %59 : vector<2x128xf32>
    %66 = arith.mulf %62, %65 : vector<2x128xf32>
    %c0_39 = arith.constant 0 : index
    %c0_40 = arith.constant 0 : index
    %c0_41 = arith.constant 0 : index
    %67 = vector.load %arg5[%c0_39, %c0_40, %c0_41] : memref<1x2x128xf32, #tpu.memory_space<vmem>>, vector<1x2x128xf32>
    %68 = vector.shape_cast %67 : vector<1x2x128xf32> to vector<2x128xf32>
    %69 = arith.addf %68, %66 : vector<2x128xf32>
    %c0_42 = arith.constant 0 : index
    %c0_43 = arith.constant 0 : index
    %c0_44 = arith.constant 0 : index
    %70 = vector.load %arg5[%c0_42, %c0_43, %c0_44] : memref<1x2x128xf32, #tpu.memory_space<vmem>>, vector<1x2x128xf32>
    %71 = vector.shape_cast %70 : vector<1x2x128xf32> to vector<2x128xf32>
    %72 = vector.shape_cast %69 : vector<2x128xf32> to vector<1x2x128xf32>
    tpu.vector_store %arg5[%c0_42, %c0_43, %c0_44], %72 {strides = array<i32>} : memref<1x2x128xf32, #tpu.memory_space<vmem>>, vector<1x2x128xf32>,
    %c0_45 = arith.constant 0 : index
    %c0_46 = arith.constant 0 : index
    %c0_47 = arith.constant 0 : index
    %73 = vector.load %arg6[%c0_45, %c0_46, %c0_47] : memref<1x2x128xf32, #tpu.memory_space<vmem>>, vector<1x2x128xf32>
    %74 = vector.shape_cast %73 : vector<1x2x128xf32> to vector<2x128xf32>
    %75 = arith.addf %74, %62 : vector<2x128xf32>
    %c0_48 = arith.constant 0 : index
    %c0_49 = arith.constant 0 : index
    %c0_50 = arith.constant 0 : index
    %76 = vector.load %arg6[%c0_48, %c0_49, %c0_50] : memref<1x2x128xf32, #tpu.memory_space<vmem>>, vector<1x2x128xf32>
    %77 = vector.shape_cast %76 : vector<1x2x128xf32> to vector<2x128xf32>
    %78 = vector.shape_cast %75 : vector<2x128xf32> to vector<1x2x128xf32>
    tpu.vector_store %arg6[%c0_48, %c0_49, %c0_50], %78 {strides = array<i32>} : memref<1x2x128xf32, #tpu.memory_space<vmem>>, vector<1x2x128xf32>,
    return
  }
  func.func @transform_0(%arg0: i32, %arg1: i32) -> (i32, i32, i32, i32) {
    %c0_i32 = arith.constant 0 : i32
    %c0_i32_0 = arith.constant 0 : i32
    %c0_i32_1 = arith.constant 0 : i32
    return %arg0, %c0_i32, %arg1, %c0_i32_0 : i32, i32, i32, i32
  }
  func.func @transform_1(%arg0: i32, %arg1: i32) -> (i32, i32, i32) {
    %c0_i32 = arith.constant 0 : i32
    %c0_i32_0 = arith.constant 0 : i32
    return %arg0, %arg1, %c0_i32 : i32, i32, i32
  }
  func.func @transform_2(%arg0: i32, %arg1: i32) -> i32 {
    %c0_i32 = arith.constant 0 : i32
    %c0_i32_0 = arith.constant 0 : i32
    return %c0_i32 : i32
  }
  func.func @transform_3(%arg0: i32, %arg1: i32) -> (i32, i32, i32) {
    %c0_i32 = arith.constant 0 : i32
    %c0_i32_0 = arith.constant 0 : i32
    %c0_i32_1 = arith.constant 0 : i32
    return %arg0, %c0_i32, %c0_i32_0 : i32, i32, i32
  }
  func.func @transform_4(%arg0: i32, %arg1: i32) -> (i32, i32, i32) {
    %c0_i32 = arith.constant 0 : i32
    %c0_i32_0 = arith.constant 0 : i32
    %c0_i32_1 = arith.constant 0 : i32
    return %arg0, %c0_i32, %c0_i32_0 : i32, i32, i32
  }
}

</mosaic_0001>

<bundles_post_ra>
// kernel: tpu_custom_call.1
= control target key start
LH: loop header
LB: loop body
LE: loop exit
PB: predicated region body
PF: predicated region fallthrough
CT: control target
= control target key end

     0   :  { %s1237_s0 = inlined_call_operand.hbm [shape: f32[2,4,2,128], index: 0, kind: input, shape index: {}]   ;;  %s1238_s1 = inlined_call_operand.hbm [shape: s32[2,2,128], index: 1, kind: input, shape index: {}]   ;;  %s1239_s2 = inlined_call_operand.vmem [shape: f32[4], index: 2, kind: input, shape index: {}]   ;;  %s1240_s3 = inlined_call_operand.hbm [shape: f32[2,2,128], index: 3, kind: output, shape index: {0}]   ;;  %s1241_s4 = inlined_call_operand.hbm [shape: f32[2,2,128], index: 4, kind: output, shape index: {1}]  }
   0x1   :  { %1248 = sst [smem:[#allocation18_spill]] %s1237_s0 }
   0x2   :  { %1249 = sst [smem:[#allocation19_spill]] %s1239_s2 }
   0x3   :  { %10 = vsyncpa [#allocation3], 0 }
   0x4   :  { %12 = vsyncpa [#allocation3 + $0x1], 0 }
   0x5   :  { %13 = vsyncpa [#allocation7], 0 }
   0x6   :  { %15 = vsyncpa [#allocation7 + $0x1], 0 }
   0x7   :  { %16 = vsyncpa [#allocation5], 0 }
   0x8   :  { %17 = vsyncpa [#allocation4], 0 }
   0x9   :  { %19 = vsyncpa [#allocation4 + $0x1], 0 }
   0xa   :  { %20 = vsyncpa [#allocation11], 0 }
   0xb   :  { %22 = vsyncpa [#allocation11 + $0x1], 0  ;;  %s897_s15 = smov 0   ;;  %s899_s16 = smov 0  }
   0xc   :  { %s901_s17 = smov 0   ;;  %s903_s18 = smov 0  }
   0xd   :  { %s905_s19 = smov 0   ;;  %s907_s20 = smov 0  }
   0xe LB: > { %s540_s21 = sadd.s32 4294967295, %s862_s20   ;;  %s541_s22 = sadd.s32 4294967294, %s862_s20   ;;  %s862_s20 = sphi %s907_s20, %s28_s20   ;;  %s858_s19 = sphi %s905_s19, %s1273_s19   ;;  %s854_s18 = sphi %s903_s18, %s1272_s18   ;;  %s850_s17 = sphi %s901_s17, %s1271_s17   ;;  %s846_s16 = sphi %s899_s16, %s1270_s16   ;;  %s842_s15 = sphi %s897_s15, %s1269_s15  }
   0xf   : > { %s49_s23 = sadd.s32 1, %s850_s17  ;;  %p56_p0 = scmp.ne.s32.totalorder %s850_s17, %s846_s16 }
  0x10   : > { %p57_p1 = scmp.eq.s32.totalorder %s862_s20, 0  ;;  %p62_p2 = scmp.ne.s32.totalorder %s846_s16, %s842_s15 }
  0x11   : > { %p935_p3 = scmp.eq.s32.totalorder %s540_s21, 0  ;;  %p135_p4 = scmp.eq.s32.totalorder %s540_s21, 1 }
  0x12   : > { %p939_p5 = por %p57_p1, %p56_p0  ;;  %p141_p6 = scmp.eq.s32.totalorder %s541_s22, 1 }
  0x13   : > { %s1250_s24 = scalar_select %p935_p3, 1, 0 }
  0x14   : > { %p945_p7 = por %p935_p3, %p62_p2  ;;  %p949_p8 = por %p135_p4, %p56_p0 }
  0x15   : > { %p953_p9 = por %p141_p6, %p62_p2  ;;  %p542_p10 = scmp.ge.s32.totalorder %s862_s20, 1 }
  0x16   : > { %s1252_s26 = scalar_select %p945_p7, 1, 0 }
  0x17   : > { %s1253_s27 = scalar_select %p949_p8, 1, 0 }
  0x18   : > { %s1254_s28 = scalar_select %p953_p9, 1, 0 }
  0x19   : > { %p174_p11 = scmp.lt.s32.totalorder %s862_s20, 3  ;;  %s1255_s2 = sld [smem:[#allocation19_spill]] }
  0x1a   : > { %p600_p0 = scmp.lt.s32.totalorder %s862_s20, 2  ;;  %s40_s9 = sadd.s32 1, %s858_s19 }
  0x1b   : > { %p962_p12 = pnand %p542_p10, %p174_p11  ;;  %p983_p6 = scmp.ge.s32.totalorder %s40_s9, 2 }
  0x1c   : > { %p972_p2 = pnand %p600_p0, %p939_p5  ;;  %s988_s11 = sand.u32 1, %s850_s17  }
  0x1d   : > { %s1256_s6 = scalar_select %p962_p12, 1, 0 }
  0x1e   : > { %p581_p1 = pneg %p962_p12 }
  0x1f   : > { %s187_s5 = sshll.u32 %s1255_s2, 4  ;;  %s188_s5 = int_to_ptr.vmem [resolvable:$true] %s187_s5 }
  0x20   : > { %p978_p4 = pnand %p581_p1, %p935_p3  ;;  %s665_s12 = scalar_lea.vmem %s188_s5, 16 }
  0x21   : > { %p666_p10 = scmp.ne.s32.totalorder %s188_s5, %s665_s12  ;;  %p673_p13 = scmp.lt.s32.totalorder %s188_s5, %s188_s5 }
  0x22   : > { %p667_p5 = pneg %p978_p4  ;;  %p674_p9 = scmp.lt.s32.totalorder %s665_s12, %s665_s12 }
  0x24   : > { %p668_p11 = pnand %p667_p5, %p666_p10  ;;  %p675_p1 = por %p674_p9, %p673_p13 }
  0x26   : > { %p669_p0 = pneg %p668_p11 }
  0x28   : > { %p676_p8 = pnand %p675_p1, %p669_p0 }
  0x2a   : > { %679 = shalt.err (!%p676_p8)
}
  0x2b   : > { %s864_s13 = smov [#allocation8]   ;;  %s1275_s9 = smov (%p983_p6, %s40_s9), 0 }
  0x2c   : > { %584 = dma.vmem_to_smem (!%p978_p4), %s188_s5, 16, %s864_s13, [#allocation5]  }
  0x2d   : > { %1260 = sst [smem:[#allocation17_spill]] %s1275_s9  ;;  %s545_s14 = sshll.u32 %s988_s11, 3 }
  0x2e   : > { %s44_s21 = ssub.s32 %s858_s19, %s1275_s9  ;;  %s568_s22 = sshll.u32 %s858_s19, 7 }
  0x2f   : > { %p47_p8 = scmp.eq.s32.totalorder %s44_s21, 0  ;;  %s1261_s0 = sld [smem:[#allocation18_spill]] }
  0x30   : > { %s202_s8 = scalar_lea.vmem [#allocation2], %s545_s14  ;;  %s199_s10 = scalar_lea.sflag [#allocation3], %s988_s11 }
  0x31   : > { %s210_s12 = sshll.u32 %s202_s8, 4  ;;  %p682_p13 = pneg %p972_p2  ;;  %s1012_s12 = int_to_ptr.vmem [resolvable:$true] %s210_s12 }
  0x32   : > { %s1010_s5 = scalar_select %p47_p8, %s850_s17, %s49_s23  }
  0x35   : > { %s1005_s30 = scalar_lea.hbm %s1261_s0, %s568_s22  ;;  %s685_s25 = scalar_lea.hbm %s1261_s0, 256 }
  0x36   : > { %s680_s13 = scalar_lea.hbm %s1005_s30, 128  ;;  %p686_p10 = scmp.lt.u32.totalorder %s1005_s30, %s1261_s0 }
  0x37   : > { %p681_p9 = scmp.ne.s32.totalorder %s1005_s30, %s680_s13  ;;  %p687_p5 = scmp.lt.u32.totalorder %s685_s25, %s680_s13 }
  0x38   : > { %p689_p0 = scmp.lt.u32.totalorder %s680_s13, %s1005_s30 }
  0x39   : > { %p683_p4 = pnand %p682_p13, %p681_p9  ;;  %p688_p11 = por %p687_p5, %p686_p10 }
  0x3b   : > { %p684_p6 = pneg %p683_p4  ;;  %p690_p1 = por %p689_p0, %p688_p11 }
  0x3d   : > { %p691_p8 = pnand %p690_p1, %p684_p6 }
  0x3f   : > { %694 = shalt.err (!%p691_p8)
}
  0x40   : > { %s695_s23 = scalar_lea.vmem %s1012_s12, 128  ;;  %s865_s8 = smov [#allocation2]  }
  0x41   : > { %p696_p9 = scmp.ne.s32.totalorder %s1012_s12, %s695_s23  ;;  %s700_s21 = sshll.u32 %s865_s8, 4  ;;  %s701_s21 = int_to_ptr.vmem [resolvable:$false] %s700_s21 }
  0x42   : > { %s702_s22 = scalar_lea.vmem %s701_s21, 256  ;;  %p703_p7 = scmp.lt.s32.totalorder %s1012_s12, %s701_s21 }
  0x43   : > { %p698_p4 = pnand %p696_p9, %p682_p13  ;;  %p704_p10 = scmp.lt.s32.totalorder %s702_s22, %s695_s23 }
  0x45   : > { %p699_p3 = pneg %p698_p4  ;;  %p705_p5 = por %p704_p10, %p703_p7 }
  0x47   : > { %p706_p11 = pnand %p705_p5, %p699_p3 }
  0x49   : > { %709 = shalt.err (!%p706_p11)
}
  0x4a   : > { %s866_s13 = smov 32   ;;  %s867_s25 = smov 2  }
  0x4b   : > { %588 = dma.hbm_to_vmem [thread:$0]  (!%p972_p2), %s1005_s30, 128, %s1012_s12, %s199_s10, %s866_s13, %s866_s13, %s867_s25  }
  0x4c   : > { %s548_s14 = sshll.u32 %s988_s11, 1  ;;  %s549_s29 = sshll.u32 %s858_s19, 5 }
  0x4d   : > { %s1047_s21 = scalar_lea.hbm %s1238_s1, %s549_s29  ;;  %s224_s22 = scalar_lea.vmem [#allocation6], %s548_s14 }
  0x4e   : > { %s232_s0 = sshll.u32 %s224_s22, 4  ;;  %s221_s2 = scalar_lea.sflag [#allocation7], %s988_s11  ;;  %s233_s0 = int_to_ptr.vmem [resolvable:$true] %s232_s0 }
  0x4f   : > { %s710_s9 = scalar_lea.hbm %s1047_s21, 32  ;;  %s715_s10 = scalar_lea.hbm %s1238_s1, 64 }
  0x50   : > { %p711_p3 = scmp.ne.s32.totalorder %s1047_s21, %s710_s9  ;;  %p716_p0 = scmp.lt.u32.totalorder %s1047_s21, %s1238_s1 }
  0x51   : > { %p717_p1 = scmp.lt.u32.totalorder %s715_s10, %s710_s9  ;;  %p719_p9 = scmp.lt.u32.totalorder %s710_s9, %s1047_s21 }
  0x52   : > { %p713_p7 = pnand %p711_p3, %p682_p13 }
  0x53   : > { %p718_p8 = por %p717_p1, %p716_p0 }
  0x54   : > { %p714_p6 = pneg %p713_p7 }
  0x55   : > { %p720_p4 = por %p719_p9, %p718_p8 }
  0x57   : > { %p721_p10 = pnand %p720_p4, %p714_p6 }
  0x59   : > { %724 = shalt.err (!%p721_p10)
}
  0x5a   : > { %s725_s11 = scalar_lea.vmem %s233_s0, 32  ;;  %s868_s14 = smov [#allocation6]  }
  0x5b   : > { %p726_p5 = scmp.ne.s32.totalorder %s233_s0, %s725_s11  ;;  %s730_s29 = sshll.u32 %s868_s14, 4  ;;  %s731_s29 = int_to_ptr.vmem [resolvable:$false] %s730_s29 }
  0x5c   : > { %s732_s8 = scalar_lea.vmem %s731_s29, 64  ;;  %p733_p7 = scmp.lt.s32.totalorder %s233_s0, %s731_s29 }
  0x5d   : > { %p728_p11 = pnand %p726_p5, %p682_p13  ;;  %p734_p12 = scmp.lt.s32.totalorder %s732_s8, %s725_s11 }
  0x5f   : > { %p729_p3 = pneg %p728_p11  ;;  %p735_p0 = por %p734_p12, %p733_p7 }
  0x61   : > { %p736_p1 = pnand %p735_p0, %p729_p3 }
  0x63   : > { %739 = shalt.err (!%p736_p1)
}
  0x64   : > { %591 = dma.hbm_to_vmem [thread:$0]  (!%p972_p2), %s1047_s21, 32, %s233_s0, %s221_s2  }
  0x65   : > { %p1262_p6 = scmp.ne.s32.totalorder %s1256_s6, 0 }
  0x66   : > { %s1072_s9 = sand.u32 (!%p1262_p6), 1, %s846_s16   ;;  %p1263_p13 = scmp.ne.s32.totalorder (!%p1262_p6), %s1252_s26, 0 }
  0x67   : > { %241 = sbr.rel (%p1262_p6) target bundleno = 190 (0xbe), region = 32  ;;  %s551_s23 = sshll.u32 (!%p1262_p6), %s1072_s9, 3 }
  0x68   : > { %s244_s22 = scalar_lea.sflag (!%p1262_p6), [#allocation3], %s1072_s9  ;;  %s247_s30 = scalar_lea.vmem (!%p1262_p6), [#allocation2], %s551_s23 }
  0x6e   : > { %821 = dma.done.wait (%p1263_p13), %s244_s22, 128  }
  0x6f   : > { %823 = vsyncadd (%p1263_p13), %s244_s22, 4294967168  ;;  %s552_s0 = sshll.u32 %s1072_s9, 1  ;;  %s253_s2 = scalar_lea.sflag [#allocation7], %s1072_s9 }
  0x70   : > { %s256_s6 = scalar_lea.vmem [#allocation6], %s552_s0 }
  0x71   : > { %825 = dma.done.wait (%p1263_p13), %s253_s2, 32  }
  0x72   : > { %827 = vsyncadd (%p1263_p13), %s253_s2, 4294967264  ;;  %p1264_p12 = scmp.ne.s32.totalorder %s1250_s24, 0 }
  0x74   : > { %829 = dma.done.wait (%p1264_p12), [#allocation5], 16  }
  0x75   : > { %831 = vsyncadd (%p1264_p12), [#allocation5], 4294967280 }
  0x76   : > { %265 = sfence }
  0x77   : > { %s1090_s7 = scalar_lea.vmem [#allocation9], %s552_s0  ;;  %v869_v0 = vmov 0.0   ;;  %s1093_s21 = scalar_lea.vmem [#allocation10], %s552_s0  ;;  %v1096_v1 = vld [vmem:[%s247_s30] sm:$0x3] }
  0x78   : > { %300 = vst [vmem:[%s1090_s7] sm:$0x3] %v869_v0  ;;  %301 = vst [vmem:[%s1093_s21] sm:$0x3] %v869_v0  ;;  %v1098_v2 = vld [vmem:[%s247_s30 + $0x2] sm:$0x3]  ;;  %v1100_v3 = vld [vmem:[%s247_s30 + $0x4] sm:$0x3] }
  0x79   : > { %v306_v4 = vmax.f32 %v1096_v1, %v1098_v2  ;;  %s319_s24 = sld [smem:[#allocation8]]  ;;  %v1104_v5 = vld [vmem:[%s247_s30 + $0x6] sm:$0x3]  ;;  %s559_s26 = sld [smem:[#allocation8 + $0x1]]  ;;  %v1106_v6 = vld [vmem:[%s256_s6] sm:$0x3] }
  0x7a   : > { %s560_s12 = sld [smem:[#allocation8 + $0x2]]  ;;  %s561_s10 = sld [smem:[#allocation8 + $0x3]]  ;;  %vm317_vm0 = vcmp.eq.s32.totalorder %v1106_v6, 0  ;;  %vm326_vm1 = vcmp.eq.s32.totalorder %v1106_v6, 1  ;;  %vm335_vm2 = vcmp.eq.s32.totalorder %v1106_v6, 2  ;;  %vm344_vm3 = vcmp.eq.s32.totalorder %v1106_v6, 3 }
  0x7b   : > { %v309_v7 = vmax.f32 %v306_v4, %v1100_v3  ;;  %s564_s13 = sshll.u32 %s854_s18, 5  ;;  %s392_s25 = sshll.u32 %s1093_s21, 4  ;;  %s1142_s25 = int_to_ptr.vmem [resolvable:$true] %s392_s25 }
  0x7c   : > { %s1140_s29 = scalar_lea.hbm %s1241_s4, %s564_s13  ;;  %s366_s8 = scalar_lea.sflag [#allocation11], %s1072_s9 }
  0x7d   : > { %v1110_v8 = vmax.f32 %v309_v7, %v1104_v5  ;;  %s740_s23 = scalar_lea.vmem %s1142_s25, 32  ;;  %p1265_p8 = scmp.ne.s32.totalorder %s1253_s27, 0 }
  0x7e   : > { %p741_p2 = scmp.ne.s32.totalorder %s1142_s25, %s740_s23  ;;  %s870_s22 = smov [#allocation10]  }
  0x7f   : > { %v313_v9 = vsub.f32 %v1096_v1, %v1110_v8  ;;  %v320_v10 = vstv %s319_s24  ;;  %v322_v11 = vsub.f32 %v1098_v2, %v1110_v8  ;;  %v331_v12 = vsub.f32 %v1100_v3, %v1110_v8  ;;  %v357_v17 = vld [vmem:[%s1093_s21] sm:$0x3]  ;;  %s744_s30 = sshll.u32 %s870_s22, 4  ;;  %s745_s30 = int_to_ptr.vmem [resolvable:$false] %s744_s30 }
  0x80   : > { %v321_v13 = vsel %vm317_vm0, %v320_v10, 0.0  ;;  %v329_v14 = vstv %s559_s26  ;;  %v338_v15 = vstv %s560_s12  ;;  %v340_v16 = vsub.f32 %v1104_v5, %v1110_v8  ;;  %p742_p9 = pnand %p741_p2, %p1265_p8  ;;  %s746_s0 = scalar_lea.vmem %s745_s30, 64 }
  0x81   : > { %v314_v18 = vmul.f32 1.442695, %v313_v9  ;;  %v323_v19 = vmul.f32 1.442695, %v322_v11  ;;  %v330_v20 = vsel %vm326_vm1, %v329_v14, %v321_v13  ;;  %v332_v21 = vmul.f32 1.442695, %v331_v12  ;;  %p747_p10 = scmp.lt.s32.totalorder %s1142_s25, %s745_s30  ;;  %p748_p5 = scmp.lt.s32.totalorder %s746_s0, %s740_s23 }
  0x82   : > { %v339_v22 = vsel %vm335_vm2, %v338_v15, %v330_v20  ;;  %v341_v23 = vmul.f32 1.442695, %v340_v16  ;;  %v347_v24 = vstv %s561_s10  ;;  %p743_p4 = pneg %p742_p9 }
  0x83   : > { %655 = vpow2.f32 %v314_v18  ;;  %v348_v25 = vsel %vm344_vm3, %v347_v24, %v339_v22  ;;  %p749_p11 = por %p748_p5, %p747_p10 }
  0x84   : > { %657 = vpow2.f32 %v323_v19  ;;  %v358_v26 = vadd.f32 %v357_v17, %v348_v25 }
  0x85   : > { %659 = vpow2.f32 %v332_v21  ;;  %p750_p3 = pnand %p749_p11, %p743_p4 }
  0x86   : > { %661 = vpow2.f32 %v341_v23  ;;  %359 = vst [vmem:[%s1093_s21] sm:$0x3] %v358_v26 }
  0x87   : > { %753 = shalt.err (!%p750_p3)
}
  0x88   : > { %s754_s2 = scalar_lea.hbm %s1140_s29, 32  ;;  %s758_s24 = scalar_lea.hbm %s1241_s4, 64 }
  0x89   : > { %p755_p7 = scmp.ne.s32.totalorder %s1140_s29, %s754_s2  ;;  %p759_p6 = scmp.lt.u32.totalorder %s1140_s29, %s1241_s4 }
  0x8a   : > { %p760_p13 = scmp.lt.u32.totalorder %s758_s24, %s754_s2  ;;  %p762_p2 = scmp.lt.u32.totalorder %s754_s2, %s1140_s29 }
  0x8b   : > { %p756_p0 = pnand %p755_p7, %p1265_p8 }
  0x8c   : > { %p761_p12 = por %p760_p13, %p759_p6 }
  0x8d   : > { %p757_p1 = pneg %p756_p0 }
  0x8e   : > { %p763_p9 = por %p762_p2, %p761_p12 }
  0x90   : > { %p764_p4 = pnand %p763_p9, %p757_p1 }
  0x92   : > { %767 = shalt.err (!%p764_p4)
}
  0x93   : > { %578 = dma.vmem_to_hbm [thread:$0]  (%p1265_p8), %s1142_s25, 32, %s1140_s29, %s366_s8   ;;  %v656_v27 = vpop.eup %655  ;;  %v318_v34 = vsel %vm317_vm0, %v1096_v1, 0.0  ;;  %v354_v42 = vld [vmem:[%s1090_s7] sm:$0x3] }
  0x94   : > { %v658_v28 = vpop.eup %657  ;;  %v327_v35 = vsel %vm326_vm1, %v1098_v2, %v318_v34  ;;  %s379_s10 = sshll.u32 %s1090_s7, 4  ;;  %s1187_s14 = scalar_lea.hbm %s1240_s3, %s564_s13  ;;  %s1189_s10 = int_to_ptr.vmem [resolvable:$true] %s379_s10 }
  0x95   : > { %v660_v29 = vpop.eup %659  ;;  %v325_v30 = vadd.f32 %v658_v28, %v656_v27  ;;  %v336_v36 = vsel %vm335_vm2, %v1100_v3, %v327_v35  ;;  %s361_s29 = scalar_lea.sflag [#allocation4], %s1072_s9  ;;  %s768_s8 = scalar_lea.vmem %s1189_s10, 32 }
  0x96   : > { %v662_v31 = vpop.eup %661  ;;  %v345_v39 = vsel %vm344_vm3, %v1104_v5, %v336_v36  ;;  %p769_p10 = scmp.ne.s32.totalorder %s1189_s10, %s768_s8  ;;  %s871_s23 = smov [#allocation9]  }
  0x97   : > { %v334_v32 = vadd.f32 %v660_v29, %v325_v30  ;;  %s772_s22 = sshll.u32 %s871_s23, 4  ;;  %s773_s22 = int_to_ptr.vmem [resolvable:$false] %s772_s22 }
  0x98   : > { %p770_p5 = pnand %p769_p10, %p1265_p8  ;;  %s774_s18 = scalar_lea.vmem %s773_s22, 64 }
  0x99   : > { %v343_v33 = vadd.f32 %v662_v31, %v334_v32  ;;  %p775_p3 = scmp.lt.s32.totalorder %s1189_s10, %s773_s22  ;;  %p776_p7 = scmp.lt.s32.totalorder %s774_s18, %s768_s8 }
  0x9a   : > { %p771_p11 = pneg %p770_p5 }
  0x9b   : > { %663 = vlog2.f32 %v343_v33  ;;  %p777_p0 = por %p776_p7, %p775_p3 }
  0x9d   : > { %p778_p1 = pnand %p777_p0, %p771_p11 }
  0xa5   : > { %v664_v37 = vpop.eup %663 }
  0xa6   : > { %v350_v38 = vmul.f32 0.6931472, %v664_v37 }
  0xa8   : > { %v351_v40 = vadd.f32 %v350_v38, %v1110_v8 }
  0xaa   : > { %v352_v41 = vsub.f32 %v351_v40, %v345_v39 }
  0xac   : > { %v353_v43 = vmul.f32 %v352_v41, %v348_v25 }
  0xae   : > { %v355_v44 = vadd.f32 %v354_v42, %v353_v43 }
  0xb0   : > { %356 = vst [vmem:[%s1090_s7] sm:$0x3] %v355_v44 }
  0xb1   : > { %781 = shalt.err (!%p778_p1)
}
  0xb2   : > { %s782_s9 = scalar_lea.hbm %s1187_s14, 32  ;;  %s786_s30 = scalar_lea.hbm %s1240_s3, 64 }
  0xb3   : > { %p783_p6 = scmp.ne.s32.totalorder %s1187_s14, %s782_s9  ;;  %p787_p2 = scmp.lt.u32.totalorder %s1187_s14, %s1240_s3 }
  0xb4   : > { %p788_p9 = scmp.lt.u32.totalorder %s786_s30, %s782_s9  ;;  %p790_p10 = scmp.lt.u32.totalorder %s782_s9, %s1187_s14 }
  0xb5   : > { %p784_p13 = pnand %p783_p6, %p1265_p8 }
  0xb6   : > { %p789_p4 = por %p788_p9, %p787_p2 }
  0xb7   : > { %p785_p12 = pneg %p784_p13 }
  0xb8   : > { %p791_p5 = por %p790_p10, %p789_p4 }
  0xba   : > { %p792_p11 = pnand %p791_p5, %p785_p12 }
  0xbc   : > { %795 = shalt.err (!%p792_p11)
}
  0xbd   : > { %577 = dma.vmem_to_hbm [thread:$0]  (%p1265_p8), %s1189_s10, 32, %s1187_s14, %s361_s29  }
  0xbe PF: > { %s404_s6 = sand.u32 1, %s842_s15   ;;  %p1266_p3 = scmp.ne.s32.totalorder %s1254_s28, 0 }
  0xbf   : > { %p1267_p7 = scmp.ge.s32.totalorder %s862_s20, 2  ;;  %s405_s21 = scalar_lea.sflag [#allocation4], %s404_s6 }
  0xc1   : > { %p593_p0 = pnand %p1267_p7, %p1266_p3 }
  0xc3   : > { %833 = dma.done.wait (!%p593_p0), %s405_s21, 32  }
  0xc4   : > { %835 = vsyncadd (!%p593_p0), %s405_s21, 4294967264  ;;  %s414_s24 = scalar_lea.sflag [#allocation11], %s404_s6 }
  0xc5   : > { %837 = dma.done.wait (!%p593_p0), %s414_s24, 32  }
  0xc6   : > { %839 = vsyncadd (!%p593_p0), %s414_s24, 4294967264  ;;  %s28_s20 = sadd.s32 1, %s862_s20   ;;  %s1268_s27 = sld [smem:[#allocation17_spill]] }
  0xc7   : > { %p25_p1 = scmp.ge.s32.totalorder %s28_s20, 4   ;;  %s1269_s15 = smov %s846_s16 }
  0xc8   : > { %s1270_s16 = smov %s850_s17  ;;  %s1271_s17 = smov %s1010_s5 }
  0xc9   : > { %s1272_s18 = smov %s858_s19  ;;  %27 = sbr.rel (!%p25_p1) target bundleno = 14 (0xe), region = 119 }
  0xcc   : > { %s1273_s19 = smov %s1268_s27 }
  0xd0   :  { %419 = vsyncpa [#allocation3], 1 }
  0xd1   :  { %421 = vsyncpa [#allocation3 + $0x1], 1 }
  0xd2   :  { %422 = vsyncpa [#allocation7], 1 }
  0xd3   :  { %424 = vsyncpa [#allocation7 + $0x1], 1 }
  0xd4   :  { %425 = vsyncpa [#allocation4], 1 }
  0xd5   :  { %427 = vsyncpa [#allocation4 + $0x1], 1 }
  0xd6   :  { %428 = vsyncpa [#allocation11], 1 }
  0xd7   :  { %430 = vsyncpa [#allocation11 + $0x1], 1 }
  0xd8   :  { %431 = vsyncpa [#allocation5], 1 }
  0xd9   :  { %433 = vsyncpa [#allocation5 + $0x1], 1 }

</bundles_post_ra>
